<compile_context>
chip_gen: v7x
topology: tpu7x:2x2x1
jax: 0.10.0
libtpu: 0.0.40
codegen_flags: <defaults>
</compile_context>

<pallas_src>
import numpy as np
import jax
import jax.numpy as jnp
from jax.experimental import pallas as pl
from jax.experimental.pallas import tpu as pltpu


def _round_up(x, m):
    return (x + m - 1) // m * m


# --------------------------------------------------------------------------- #
# Fused kernel: whole layer stack on one row-tile of the flattened (B*N, HC) input
# --------------------------------------------------------------------------- #
def final_tanh_f2_kernel(x_ref, *refs):
    """refs = (w0, b0, w1, b1, ..., w_out, b_out, out_ref).

    w_i : (in_i, out_i) matmul matrix (1x1 conv weight, already transposed),
          possibly bf16.
    b_i : (1, out_i), f32.
    """
    out_ref = refs[-1]
    wb = refs[:-1]
    n_lin = len(wb) // 2

    h = x_ref[...]                                   # (tm, HC), compute dtype
    # start_conv + hidden linears, each followed by ReLU.
    # MXU matmul in (possibly) bf16 with f32 accumulation; bias/ReLU in f32.
    for i in range(n_lin - 1):
        w = wb[2 * i][...]
        b = wb[2 * i + 1][...]
        acc = jnp.dot(h.astype(w.dtype), w, preferred_element_type=jnp.float32)
        h = jnp.maximum(acc + b, 0.0)
    # linear_out (no ReLU) + tanh, all f32 on the output side.
    w = wb[-2][...]
    b = wb[-1][...]
    acc = jnp.dot(h.astype(w.dtype), w, preferred_element_type=jnp.float32)
    out_ref[...] = jnp.tanh(acc + b).astype(out_ref.dtype)


# --------------------------------------------------------------------------- #
# Wrapper
# --------------------------------------------------------------------------- #
def final_tanh_f2(z, weights, biases, *, input_channels, hidden_channels,
                  compute_dtype=jnp.bfloat16, tm_max=1024):
    """z: (B, N, hidden_channels) -> (B, N, hidden_channels, input_channels).

    weights[i]: (in_i, out_i); biases[i]: (1, out_i).  The last layer has
    out = hidden_channels * input_channels with channel order hc * IC + ic,
    matching the PyTorch `.view(..., hidden_channels, input_channels)`.
    `compute_dtype` is the MXU operand dtype (bf16 recommended); accumulation,
    bias, ReLU and tanh are always f32.
    """
    B, N, HC = z.shape
    assert HC == hidden_channels
    M = B * N
    out_dim = hidden_channels * input_channels
    out_dim_pad = _round_up(out_dim, 128)     # lane-dense output stores

    # ---- row tiling ---------------------------------------------------------
    # Fixed tile + padded M (never tm = M for large M): bounds VMEM and keeps
    # the grid parallel.  For M > tm_max keep >= 2 grid steps so v7x's two
    # TensorCores both get work.
    if M <= tm_max:
        tm = _round_up(M, 8)                              # single step, sublane aligned
    else:
        tm = min(tm_max, _round_up(pl.cdiv(M, 2), 128))   # >= 2 steps, <= 1024 rows
    M_pad = _round_up(M, tm)
    grid = (M_pad // tm,)

    # ---- operand prep -------------------------------------------------------
    x = z.reshape(M, HC).astype(compute_dtype)
    if M_pad != M:
        x = jnp.pad(x, ((0, M_pad - M), (0, 0)))          # zero rows, sliced off below

    params = []
    in_specs = [pl.BlockSpec((tm, HC), lambda i: (i, 0))]
    n_layers = len(weights)
    for li, (w, b) in enumerate(zip(weights, biases)):
        w = w.astype(compute_dtype)
        b = b.astype(jnp.float32)
        if li == n_layers - 1 and out_dim_pad != out_dim:
            w = jnp.pad(w, ((0, 0), (0, out_dim_pad - out_dim)))
            b = jnp.pad(b, ((0, 0), (0, out_dim_pad - out_dim)))
        params += [w, b]
        # Grid-invariant blocks: weights/biases stay resident in VMEM.
        in_specs += [pl.BlockSpec(w.shape, lambda i: (0, 0)),
                     pl.BlockSpec(b.shape, lambda i: (0, 0))]

    # ---- cost estimate (scheduler hint) -------------------------------------
    w_list = params[0::2]
    flops = sum(2 * M_pad * int(w.shape[0]) * int(w.shape[1]) for w in w_list)
    param_bytes = sum(int(np.prod(p.shape)) * p.dtype.itemsize for p in params)
    cost = pl.CostEstimate(
        flops=flops,
        transcendentals=M_pad * out_dim_pad,                       # tanh
        bytes_accessed=(x.size * x.dtype.itemsize
                        + M_pad * out_dim_pad * 4
                        + param_bytes))

    out = pl.pallas_call(
        final_tanh_f2_kernel,
        out_shape=jax.ShapeDtypeStruct((M_pad, out_dim_pad), jnp.float32),
        grid=grid,
        in_specs=in_specs,
        out_specs=pl.BlockSpec((tm, out_dim_pad), lambda i: (i, 0)),
        compiler_params=pltpu.CompilerParams(
            dimension_semantics=("parallel",)),
        cost_estimate=cost,
    )(x, *params)

    out = out[:M, :out_dim]
    return out.reshape(B, N, hidden_channels, input_channels)


# --------------------------------------------------------------------------- #
# Deterministic synthetic parameters + driver
# --------------------------------------------------------------------------- #
if __name__ == "__main__":
    B, N = 2, 16                       # batch, num_nodes
    input_channels = 4
    hidden_channels = 32
    hidden_hidden_channels = 32        # stored by the module but unused by its layers
    num_hidden_layers = 3              # start_conv + (L-1) hidden linears + linear_out

    key = jax.random.PRNGKey(0)
    k_z, k_p = jax.random.split(key)
    z = jax.random.normal(k_z, (B, N, hidden_channels), jnp.float32)

    # Synthesize 1x1-conv weights directly as (in, out) matmul matrices.
    # (PyTorch stores (out, in, 1, 1); a 1x1 conv over channels == x @ W.T + b.)
    dims = ([(hidden_channels, hidden_channels)] * num_hidden_layers
            + [(hidden_channels, hidden_channels * input_channels)])
    keys = jax.random.split(k_p, 2 * len(dims))
    weights, biases = [], []
    for li, (din, dout) in enumerate(dims):
        s = 1.0 / np.sqrt(din)
        weights.append(s * jax.random.normal(keys[2 * li], (din, dout), jnp.float32))
        biases.append(s * jax.random.normal(keys[2 * li + 1], (1, dout), jnp.float32))

    # Pure-JAX reference of the PyTorch forward.
    def ref_forward(zz):
        h = zz.reshape(B * N, hidden_channels)
        for w, b in zip(weights[:-1], biases[:-1]):
            h = jnp.maximum(h @ w + b, 0.0)
        o = jnp.tanh(h @ weights[-1] + biases[-1])
        return o.reshape(B, N, hidden_channels, input_channels)

    ref = np.asarray(ref_forward(z))

    # 1) Correctness gate: f32 matmul path matches the reference to 1e-5.
    out_f32 = final_tanh_f2(z, weights, biases,
                            input_channels=input_channels,
                            hidden_channels=hidden_channels,
                            compute_dtype=jnp.float32)
    jax.block_until_ready(out_f32)
    assert out_f32.shape == (B, N, hidden_channels, input_channels)
    np.testing.assert_allclose(np.asarray(out_f32), ref, rtol=1e-5, atol=1e-5)

    # 2) Performance path: bf16 MXU operands, f32 accumulation/bias/ReLU/tanh.
    #    Looser gate accounts for bf16 operand rounding (output is tanh-bounded).
    out_bf16 = final_tanh_f2(z, weights, biases,
                             input_channels=input_channels,
                             hidden_channels=hidden_channels,
                             compute_dtype=jnp.bfloat16)
    jax.block_until_ready(out_bf16)
    assert out_bf16.shape == (B, N, hidden_channels, input_channels)
    np.testing.assert_allclose(np.asarray(out_bf16), ref, rtol=0.0, atol=5e-2)

    print("KERNEL_OK")
</pallas_src>

<mosaic_0001>
module attributes {stable_mosaic.version = 11 : i64} {
  func.func @final_tanh_f2_kernel(%arg0: i32, %arg1: memref<32x32xf32, #tpu.memory_space<vmem>>, %arg2: memref<32x32xf32, #tpu.memory_space<vmem>>, %arg3: memref<1x32xf32, #tpu.memory_space<vmem>>, %arg4: memref<32x32xf32, #tpu.memory_space<vmem>>, %arg5: memref<1x32xf32, #tpu.memory_space<vmem>>, %arg6: memref<32x32xf32, #tpu.memory_space<vmem>>, %arg7: memref<1x32xf32, #tpu.memory_space<vmem>>, %arg8: memref<32x128xf32, #tpu.memory_space<vmem>>, %arg9: memref<1x128xf32, #tpu.memory_space<vmem>>, %arg10: memref<32x128xf32, #tpu.memory_space<vmem>>) attributes {dimension_semantics = [#tpu.dimension_semantics<parallel>], iteration_bounds = array<i64: 1>, scalar_prefetch = 0 : i64, scratch_operands = 0 : i64, tpu.core_type = #tpu.core_type<tc>, window_params = [{transform_indices = @transform_0, window_bounds = array<i64: 32, 32>}, {pipeline_mode = #tpu.pipeline_mode<synchronous>, transform_indices = @transform_1, window_bounds = array<i64: 32, 32>}, {pipeline_mode = #tpu.pipeline_mode<synchronous>, transform_indices = @transform_2, window_bounds = array<i64: 1, 32>}, {pipeline_mode = #tpu.pipeline_mode<synchronous>, transform_indices = @transform_3, window_bounds = array<i64: 32, 32>}, {pipeline_mode = #tpu.pipeline_mode<synchronous>, transform_indices = @transform_4, window_bounds = array<i64: 1, 32>}, {pipeline_mode = #tpu.pipeline_mode<synchronous>, transform_indices = @transform_5, window_bounds = array<i64: 32, 32>}, {pipeline_mode = #tpu.pipeline_mode<synchronous>, transform_indices = @transform_6, window_bounds = array<i64: 1, 32>}, {pipeline_mode = #tpu.pipeline_mode<synchronous>, transform_indices = @transform_7, window_bounds = array<i64: 32, 128>}, {pipeline_mode = #tpu.pipeline_mode<synchronous>, transform_indices = @transform_8, window_bounds = array<i64: 1, 128>}, {transform_indices = @transform_9, window_bounds = array<i64: 32, 128>}]} {
    %c0 = arith.constant 0 : index
    %c0_0 = arith.constant 0 : index
    %0 = vector.load %arg1[%c0, %c0_0] : memref<32x32xf32, #tpu.memory_space<vmem>>, vector<32x32xf32>
    %c0_1 = arith.constant 0 : index
    %c0_2 = arith.constant 0 : index
    %1 = vector.load %arg2[%c0_1, %c0_2] : memref<32x32xf32, #tpu.memory_space<vmem>>, vector<32x32xf32>
    %c0_3 = arith.constant 0 : index
    %c0_4 = arith.constant 0 : index
    %2 = vector.load %arg3[%c0_3, %c0_4] : memref<1x32xf32, #tpu.memory_space<vmem>>, vector<1x32xf32>
    %cst = arith.constant dense<0.000000e+00> : vector<32x32xf32>
    %3 = tpu.matmul %0, %1, %cst {dimension_numbers = #tpu.dot_dimension_numbers<[1], [0], [0], [1], [0, 0, 1, 1], [], []>} : vector<32x32xf32>, vector<32x32xf32>, vector<32x32xf32> -> vector<32x32xf32>
    %4 = vector.broadcast %2 : vector<1x32xf32> to vector<32x32xf32>
    %5 = arith.addf %3, %4 : vector<32x32xf32>
    %cst_5 = arith.constant 0.000000e+00 : f32
    %6 = vector.broadcast %cst_5 : f32 to vector<32x32xf32>
    %7 = arith.maximumf %5, %6 : vector<32x32xf32>
    %c0_6 = arith.constant 0 : index
    %c0_7 = arith.constant 0 : index
    %8 = vector.load %arg4[%c0_6, %c0_7] : memref<32x32xf32, #tpu.memory_space<vmem>>, vector<32x32xf32>
    %c0_8 = arith.constant 0 : index
    %c0_9 = arith.constant 0 : index
    %9 = vector.load %arg5[%c0_8, %c0_9] : memref<1x32xf32, #tpu.memory_space<vmem>>, vector<1x32xf32>
    %cst_10 = arith.constant dense<0.000000e+00> : vector<32x32xf32>
    %10 = tpu.matmul %7, %8, %cst_10 {dimension_numbers = #tpu.dot_dimension_numbers<[1], [0], [0], [1], [0, 0, 1, 1], [], []>} : vector<32x32xf32>, vector<32x32xf32>, vector<32x32xf32> -> vector<32x32xf32>
    %11 = vector.broadcast %9 : vector<1x32xf32> to vector<32x32xf32>
    %12 = arith.addf %10, %11 : vector<32x32xf32>
    %cst_11 = arith.constant 0.000000e+00 : f32
    %13 = vector.broadcast %cst_11 : f32 to vector<32x32xf32>
    %14 = arith.maximumf %12, %13 : vector<32x32xf32>
    %c0_12 = arith.constant 0 : index
    %c0_13 = arith.constant 0 : index
    %15 = vector.load %arg6[%c0_12, %c0_13] : memref<32x32xf32, #tpu.memory_space<vmem>>, vector<32x32xf32>
    %c0_14 = arith.constant 0 : index
    %c0_15 = arith.constant 0 : index
    %16 = vector.load %arg7[%c0_14, %c0_15] : memref<1x32xf32, #tpu.memory_space<vmem>>, vector<1x32xf32>
    %cst_16 = arith.constant dense<0.000000e+00> : vector<32x32xf32>
    %17 = tpu.matmul %14, %15, %cst_16 {dimension_numbers = #tpu.dot_dimension_numbers<[1], [0], [0], [1], [0, 0, 1, 1], [], []>} : vector<32x32xf32>, vector<32x32xf32>, vector<32x32xf32> -> vector<32x32xf32>
    %18 = vector.broadcast %16 : vector<1x32xf32> to vector<32x32xf32>
    %19 = arith.addf %17, %18 : vector<32x32xf32>
    %cst_17 = arith.constant 0.000000e+00 : f32
    %20 = vector.broadcast %cst_17 : f32 to vector<32x32xf32>
    %21 = arith.maximumf %19, %20 : vector<32x32xf32>
    %c0_18 = arith.constant 0 : index
    %c0_19 = arith.constant 0 : index
    %22 = vector.load %arg8[%c0_18, %c0_19] : memref<32x128xf32, #tpu.memory_space<vmem>>, vector<32x128xf32>
    %c0_20 = arith.constant 0 : index
    %c0_21 = arith.constant 0 : index
    %23 = vector.load %arg9[%c0_20, %c0_21] : memref<1x128xf32, #tpu.memory_space<vmem>>, vector<1x128xf32>
    %cst_22 = arith.constant dense<0.000000e+00> : vector<32x128xf32>
    %24 = tpu.matmul %21, %22, %cst_22 {dimension_numbers = #tpu.dot_dimension_numbers<[1], [0], [0], [1], [0, 0, 1, 1], [], []>} : vector<32x32xf32>, vector<32x128xf32>, vector<32x128xf32> -> vector<32x128xf32>
    %25 = vector.broadcast %23 : vector<1x128xf32> to vector<32x128xf32>
    %26 = arith.addf %24, %25 : vector<32x128xf32>
    %27 = math.tanh %26 : vector<32x128xf32>
    %c0_23 = arith.constant 0 : index
    %c0_24 = arith.constant 0 : index
    %28 = vector.load %arg10[%c0_23, %c0_24] : memref<32x128xf32, #tpu.memory_space<vmem>>, vector<32x128xf32>
    tpu.vector_store %arg10[%c0_23, %c0_24], %27 {strides = array<i32>} : memref<32x128xf32, #tpu.memory_space<vmem>>, vector<32x128xf32>,
    return
  }
  func.func @transform_0(%arg0: i32) -> (i32, i32) {
    %c0_i32 = arith.constant 0 : i32
    %c0_i32_0 = arith.constant 0 : i32
    return %arg0, %c0_i32 : i32, i32
  }
  func.func @transform_1(%arg0: i32) -> (i32, i32) {
    %c0_i32 = arith.constant 0 : i32
    %c0_i32_0 = arith.constant 0 : i32
    %c0_i32_1 = arith.constant 0 : i32
    return %c0_i32, %c0_i32_0 : i32, i32
  }
  func.func @transform_2(%arg0: i32) -> (i32, i32) {
    %c0_i32 = arith.constant 0 : i32
    %c0_i32_0 = arith.constant 0 : i32
    %c0_i32_1 = arith.constant 0 : i32
    return %c0_i32, %c0_i32_0 : i32, i32
  }
  func.func @transform_3(%arg0: i32) -> (i32, i32) {
    %c0_i32 = arith.constant 0 : i32
    %c0_i32_0 = arith.constant 0 : i32
    %c0_i32_1 = arith.constant 0 : i32
    return %c0_i32, %c0_i32_0 : i32, i32
  }
  func.func @transform_4(%arg0: i32) -> (i32, i32) {
    %c0_i32 = arith.constant 0 : i32
    %c0_i32_0 = arith.constant 0 : i32
    %c0_i32_1 = arith.constant 0 : i32
    return %c0_i32, %c0_i32_0 : i32, i32
  }
  func.func @transform_5(%arg0: i32) -> (i32, i32) {
    %c0_i32 = arith.constant 0 : i32
    %c0_i32_0 = arith.constant 0 : i32
    %c0_i32_1 = arith.constant 0 : i32
    return %c0_i32, %c0_i32_0 : i32, i32
  }
  func.func @transform_6(%arg0: i32) -> (i32, i32) {
    %c0_i32 = arith.constant 0 : i32
    %c0_i32_0 = arith.constant 0 : i32
    %c0_i32_1 = arith.constant 0 : i32
    return %c0_i32, %c0_i32_0 : i32, i32
  }
  func.func @transform_7(%arg0: i32) -> (i32, i32) {
    %c0_i32 = arith.constant 0 : i32
    %c0_i32_0 = arith.constant 0 : i32
    %c0_i32_1 = arith.constant 0 : i32
    return %c0_i32, %c0_i32_0 : i32, i32
  }
  func.func @transform_8(%arg0: i32) -> (i32, i32) {
    %c0_i32 = arith.constant 0 : i32
    %c0_i32_0 = arith.constant 0 : i32
    %c0_i32_1 = arith.constant 0 : i32
    return %c0_i32, %c0_i32_0 : i32, i32
  }
  func.func @transform_9(%arg0: i32) -> (i32, i32) {
    %c0_i32 = arith.constant 0 : i32
    %c0_i32_0 = arith.constant 0 : i32
    return %arg0, %c0_i32 : i32, i32
  }
}

</mosaic_0001>

<bundles_post_ra>
// kernel: tpu_custom_call.1
= control target key start
LH: loop header
LB: loop body
LE: loop exit
PB: predicated region body
PF: predicated region fallthrough
CT: control target
= control target key end

     0   :  { %14 = vsyncpa [#allocation3], 0  ;;  %s1063_s0 = inlined_call_operand.hbm [shape: f32[32,32], index: 0, kind: input, shape index: {}]   ;;  %s1064_s1 = inlined_call_operand.hbm [shape: f32[32,32], index: 1, kind: input, shape index: {}]   ;;  %s1065_s2 = inlined_call_operand.vmem [shape: f32[1,32], index: 2, kind: input, shape index: {}]   ;;  %s1066_s3 = inlined_call_operand.hbm [shape: f32[32,32], index: 3, kind: input, shape index: {}]   ;;  %s1067_s4 = inlined_call_operand.vmem [shape: f32[1,32], index: 4, kind: input, shape index: {}]   ;;  %s1068_s5 = inlined_call_operand.hbm [shape: f32[32,32], index: 5, kind: input, shape index: {}]   ;;  %s1069_s6 = inlined_call_operand.vmem [shape: f32[1,32], index: 6, kind: input, shape index: {}]   ;;  %s1070_s7 = inlined_call_operand.hbm [shape: f32[32,128], index: 7, kind: input, shape index: {}]   ;;  %s1071_s8 = inlined_call_operand.vmem [shape: f32[1,128], index: 8, kind: input, shape index: {}]   ;;  %s1072_s9 = inlined_call_operand.hbm [shape: f32[32,128], index: 9, kind: output, shape index: {}]  }
   0x1   :  { %15 = vsyncpa [#allocation6], 0 }
   0x2   :  { %16 = vsyncpa [#allocation9], 0 }
   0x3   :  { %17 = vsyncpa [#allocation4], 0  ;;  %s873_s30 = smov [#allocation5]   ;;  %s874_s11 = smov [#allocation8]  }
   0x4   :  { %s35_s10 = sshll.u32 %s873_s30, 4  ;;  %s63_s12 = sshll.u32 %s874_s11, 4  ;;  %s36_s10 = int_to_ptr.vmem [resolvable:$true] %s35_s10  ;;  %s931_s12 = int_to_ptr.vmem [resolvable:$true] %s63_s12 }
   0x5   :  { %s733_s15 = scalar_lea.hbm %s1064_s1, 512 }
   0x6   :  { %p734_p0 = scmp.ne.s32.totalorder %s1064_s1, %s733_s15  ;;  %p737_p1 = scmp.lt.u32.totalorder %s733_s15, %s1064_s1 }
   0x8   :  { %p739_p2 = pnand %p737_p1, %p734_p0 }
   0xa   :  { %742 = shalt.err (!%p739_p2)
}
   0xb   :  { %s743_s20 = scalar_lea.vmem %s36_s10, 512  ;;  %p748_p4 = scmp.lt.s32.totalorder %s36_s10, %s36_s10 }
   0xc   :  { %p744_p3 = scmp.ne.s32.totalorder %s36_s10, %s743_s20  ;;  %p749_p5 = scmp.lt.s32.totalorder %s743_s20, %s743_s20 }
   0xe   :  { %p750_p6 = por %p749_p5, %p748_p4 }
  0x10   :  { %p751_p7 = pnand %p750_p6, %p744_p3 }
  0x12   :  { %754 = shalt.err (!%p751_p7)
}
  0x13   :  { %s875_s21 = smov 128   ;;  %s876_s22 = smov 8  }
  0x14   :  { %41 = dma.hbm_to_vmem [thread:$0]  %s1064_s1, 512, %s36_s10, [#allocation6], %s875_s21, %s875_s21, %s876_s22  }
  0x15   :  { %s755_s27 = scalar_lea.hbm %s1068_s5, 512 }
  0x16   :  { %p756_p8 = scmp.ne.s32.totalorder %s1068_s5, %s755_s27  ;;  %p759_p9 = scmp.lt.u32.totalorder %s755_s27, %s1068_s5 }
  0x18   :  { %p761_p10 = pnand %p759_p9, %p756_p8 }
  0x1a   :  { %764 = shalt.err (!%p761_p10)
}
  0x1b   :  { %s765_s13 = scalar_lea.vmem %s931_s12, 512  ;;  %p770_p12 = scmp.lt.s32.totalorder %s931_s12, %s931_s12 }
  0x1c   :  { %p766_p11 = scmp.ne.s32.totalorder %s931_s12, %s765_s13  ;;  %p771_p13 = scmp.lt.s32.totalorder %s765_s13, %s765_s13 }
  0x1e   :  { %p772_p0 = por %p771_p13, %p770_p12 }
  0x20   :  { %p773_p1 = pnand %p772_p0, %p766_p11 }
  0x22   :  { %776 = shalt.err (!%p773_p1)
}
  0x23   :  { %69 = dma.hbm_to_vmem [thread:$0]  %s1068_s5, 512, %s931_s12, [#allocation9], %s875_s21, %s875_s21, %s876_s22  }
  0x24   :  { %s877_s14 = smov [#allocation2]   ;;  %s878_s16 = smov [#allocation7]  }
  0x25   :  { %s23_s15 = sshll.u32 %s877_s14, 4  ;;  %s49_s17 = sshll.u32 %s878_s16, 4  ;;  %s24_s15 = int_to_ptr.vmem [resolvable:$true] %s23_s15  ;;  %s968_s17 = int_to_ptr.vmem [resolvable:$true] %s49_s17 }
  0x26   :  { %s777_s20 = scalar_lea.hbm %s1063_s0, 512 }
  0x27   :  { %p778_p2 = scmp.ne.s32.totalorder %s1063_s0, %s777_s20  ;;  %p781_p3 = scmp.lt.u32.totalorder %s777_s20, %s1063_s0 }
  0x29   :  { %p783_p4 = pnand %p781_p3, %p778_p2 }
  0x2b   :  { %786 = shalt.err (!%p783_p4)
}
  0x2c   :  { %s787_s5 = scalar_lea.vmem %s24_s15, 512  ;;  %p792_p6 = scmp.lt.s32.totalorder %s24_s15, %s24_s15 }
  0x2d   :  { %p788_p5 = scmp.ne.s32.totalorder %s24_s15, %s787_s5  ;;  %p793_p7 = scmp.lt.s32.totalorder %s787_s5, %s787_s5 }
  0x2f   :  { %p794_p8 = por %p793_p7, %p792_p6 }
  0x31   :  { %p795_p9 = pnand %p794_p8, %p788_p5 }
  0x33   :  { %798 = shalt.err (!%p795_p9)
}
  0x34   :  { %29 = dma.hbm_to_vmem [thread:$0]  %s1063_s0, 512, %s24_s15, [#allocation3], %s875_s21, %s875_s21, %s876_s22  }
  0x35   :  { %s799_s30 = scalar_lea.hbm %s1066_s3, 512 }
  0x36   :  { %p800_p10 = scmp.ne.s32.totalorder %s1066_s3, %s799_s30  ;;  %p803_p11 = scmp.lt.u32.totalorder %s799_s30, %s1066_s3 }
  0x38   :  { %p805_p12 = pnand %p803_p11, %p800_p10 }
  0x3a   :  { %808 = shalt.err (!%p805_p12)
}
  0x3b   :  { %s809_s14 = scalar_lea.vmem %s968_s17, 512  ;;  %p814_p0 = scmp.lt.s32.totalorder %s968_s17, %s968_s17 }
  0x3c   :  { %p810_p13 = scmp.ne.s32.totalorder %s968_s17, %s809_s14  ;;  %p815_p1 = scmp.lt.s32.totalorder %s809_s14, %s809_s14 }
  0x3e   :  { %p816_p2 = por %p815_p1, %p814_p0 }
  0x40   :  { %p817_p3 = pnand %p816_p2, %p810_p13 }
  0x42   :  { %820 = shalt.err (!%p817_p3)
}
  0x43   :  { %55 = dma.hbm_to_vmem [thread:$0]  %s1066_s3, 512, %s968_s17, [#allocation6], %s875_s21, %s875_s21, %s876_s22  }
  0x44   :  { %s879_s16 = smov [#allocation10]   ;;  %s821_s23 = scalar_lea.hbm %s1070_s7, 512 }
  0x45   :  { %s77_s18 = sshll.u32 %s879_s16, 4  ;;  %p822_p4 = scmp.ne.s32.totalorder %s1070_s7, %s821_s23  ;;  %s78_s18 = int_to_ptr.vmem [resolvable:$true] %s77_s18 }
  0x46   :  { %p825_p5 = scmp.lt.u32.totalorder %s821_s23, %s1070_s7 }
  0x48   :  { %p827_p6 = pnand %p825_p5, %p822_p4 }
  0x4a   :  { %830 = shalt.err (!%p827_p6)
}
  0x4b   :  { %s831_s12 = scalar_lea.vmem %s78_s18, 512  ;;  %p836_p8 = scmp.lt.s32.totalorder %s78_s18, %s78_s18 }
  0x4c   :  { %p832_p7 = scmp.ne.s32.totalorder %s78_s18, %s831_s12  ;;  %p837_p9 = scmp.lt.s32.totalorder %s831_s12, %s831_s12 }
  0x4e   :  { %p838_p10 = por %p837_p9, %p836_p8 }
  0x50   :  { %p839_p11 = pnand %p838_p10, %p832_p7 }
  0x52   :  { %842 = shalt.err (!%p839_p11)
}
  0x53   :  { %83 = dma.hbm_to_vmem [thread:$0]  %s1070_s7, 512, %s78_s18, [#allocation9], %s875_s21, %s875_s21, %s876_s22  }
  0x54   :  { %865 = dma.done.wait [#allocation3], 512  }
  0x55   :  { %866 = vsyncadd [#allocation3], 4294966784 }
  0x56   :  { %867 = dma.done.wait [#allocation6], 1024  }
  0x57   :  { %868 = vsyncadd [#allocation6], 4294966272 }
  0x58   :  { %869 = dma.done.wait [#allocation9], 1024  }
  0x59   :  { %870 = vsyncadd [#allocation9], 4294966272  ;;  %vm116_vm0 = vcmask 261120   ;;  %v105_v0 = vld [vmem:[#allocation5] sm:$0xff]  ;;  %v106_v1 = vld [vmem:[#allocation5 + $0x8] sm:$0xff]  ;;  %s880_s11 = smov [#allocation11]  }
  0x5a   :  { %v107_v2 = vld [vmem:[#allocation5 + $0x10] sm:$0xff]  ;;  %v685_v3 = vpack.c.bf16 %v106_v1, %v105_v0  ;;  %v108_v4 = vld [vmem:[#allocation5 + $0x18] sm:$0xff]  ;;  %v101_v5 = vld [vmem:[#allocation2] sm:$0xff]  ;;  %s563_s13 = sshll.u32 %s880_s11, 4  ;;  %s564_s13 = int_to_ptr.vmem [resolvable:$true] %s563_s13 }
  0x5b   :  { %v689_v6 = vpack.c.bf16 %v108_v4, %v107_v2  ;;  %637 = vmatprep.mubr.msk.f32.mxu0 %vm116_vm0, %v101_v5  ;;  %v218_v7 = vld [vmem:[#allocation7] sm:$0xff]  ;;  %v219_v8 = vld [vmem:[#allocation7 + $0x8] sm:$0xff]  ;;  %v103_v11 = vld [vmem:[#allocation2 + $0x10] sm:$0xff]  ;;  %p848_p13 = scmp.lt.s32.totalorder %s564_s13, %s564_s13 }
  0x5c   :  { %686 = vmatprep.subr.bf16.mxu0 %v685_v3  ;;  %v693_v9 = vpack.c.bf16 %v219_v8, %v218_v7  ;;  %v102_v10 = vld [vmem:[#allocation2 + $0x8] sm:$0xff]  ;;  %v104_v12 = vld [vmem:[#allocation2 + $0x18] sm:$0xff]  ;;  %v220_v13 = vld [vmem:[#allocation7 + $0x10] sm:$0xff] }
  0x5d   :  { %688 = vmatpush3.bf16.msra.mxu0 %v685_v3  ;;  %v221_v14 = vld [vmem:[#allocation7 + $0x18] sm:$0xff]  ;;  %v330_v16 = vld [vmem:[#allocation8] sm:$0xff]  ;;  %v331_v17 = vld [vmem:[#allocation8 + $0x8] sm:$0xff] }
  0x5e   :  { %690 = vmatprep.subr.bf16.mxu0 %v689_v6  ;;  %694 = vmatprep.subr.bf16.mxu1 %v693_v9  ;;  %v697_v15 = vpack.c.bf16 %v221_v14, %v220_v13  ;;  %v701_v18 = vpack.c.bf16 %v331_v17, %v330_v16  ;;  %v577_v19 = vld [vmem:[%s1065_s2] ss:$0 sm:$0xff]  ;;  %v332_v32 = vld [vmem:[#allocation8 + $0x10] sm:$0xff]  ;;  %v333_v33 = vld [vmem:[#allocation8 + $0x18] sm:$0xff] }
  0x5f   :  { %696 = vmatpush3.bf16.msra.mxu1 %v693_v9  ;;  %v705_v34 = vpack.c.bf16 %v333_v33, %v332_v32  ;;  %v442_v35 = vld [vmem:[#allocation10] sm:$0xff]  ;;  %v443_v36 = vld [vmem:[#allocation10 + $0x8] sm:$0xff]  ;;  %v444_v51 = vld [vmem:[#allocation10 + $0x10] sm:$0xff] }
  0x60   :  { %698 = vmatprep.subr.bf16.mxu1 %v697_v15  ;;  %v709_v37 = vpack.c.bf16 %v443_v36, %v442_v35  ;;  %v582_v38 = vld [vmem:[%s1067_s4] ss:$0 sm:$0xff]  ;;  %v445_v52 = vld [vmem:[#allocation10 + $0x18] sm:$0xff] }
  0x61   :  { %692 = vmatpush3.bf16.msra.mxu0 %v689_v6  ;;  %v713_v53 = vpack.c.bf16 %v445_v52, %v444_v51  ;;  %v587_v54 = vld [vmem:[%s1069_s6] ss:$0 sm:$0xff] }
  0x62   :  { %702 = vmatprep.subr.bf16.mxu0 %v701_v18  ;;  %v592_v3 = vld [vmem:[%s1071_s8] ss:$0 sm:$0xff]  ;;  %s843_s8 = scalar_lea.vmem %s564_s13, 512 }
  0x63   :  { %700 = vmatpush3.bf16.msra.mxu1 %v697_v15  ;;  %p844_p12 = scmp.ne.s32.totalorder %s564_s13, %s843_s8  ;;  %p849_p0 = scmp.lt.s32.totalorder %s843_s8, %s843_s8 }
  0x64   :  { %638 = vmatmul.mubr.msk.f32.vlgmr.msra.gmra.mrb[0].mxu0 %vm116_vm0, %v102_v10  ;;  %710 = vmatprep.subr.bf16.mxu1 %v709_v37 }
  0x65   :  { %640 = vmatprep.mubr.msk.f32.mxu0 %vm116_vm0, %v103_v11  ;;  %704 = vmatpush3.bf16.msra.mxu0 %v701_v18  ;;  %p850_p1 = por %p849_p0, %p848_p13 }
  0x66   :  { %706 = vmatprep.subr.bf16.mxu0 %v705_v34 }
  0x67   :  { %p851_p2 = pnand %p850_p1, %p844_p12 }
  0x68   :  { %641 = vmatmul.mubr.msk.f32.gmra.mrb[2].mxu0 %vm116_vm0, %v104_v12 }
  0x69   :  { %708 = vmatpush3.bf16.msra.mxu0 %v705_v34 }
 0x137   :  { %v639_v20 = vpop.f32.mrb[0].mxu0 }
 0x138   :  { %v201_v21 = vadd.f32 %v639_v20, %v577_v19  ;;  %v195_v22 = vpop.f32.mrb[1].mxu0 }
 0x139   :  { %v196_v23 = vadd.f32 %v577_v19, %v195_v22 }
 0x13a   :  { %v215_v26 = vmax.f32 %v201_v21, 0.0 }
 0x13b   :  { %v214_v24 = vmax.f32 %v196_v23, 0.0  ;;  %v642_v25 = vpop.f32.mrb[2].mxu0 }
 0x13c   :  { %v211_v27 = vadd.f32 %v642_v25, %v577_v19  ;;  %v205_v28 = vpop.f32.mrb[3].mxu0 }
 0x13d   :  { %v206_v29 = vadd.f32 %v577_v19, %v205_v28  ;;  %651 = vmatprep.mubr.msk.f32.mxu1 %vm116_vm0, %v214_v24 }
 0x13e   :  { %652 = vmatmul.mubr.msk.f32.vlgmr.msra.gmra.mrb[0].mxu1 %vm116_vm0, %v215_v26  ;;  %v217_v31 = vmax.f32 %v211_v27, 0.0 }
 0x13f   :  { %v216_v30 = vmax.f32 %v206_v29, 0.0  ;;  %712 = vmatpush3.bf16.msra.mxu1 %v709_v37 }
 0x140   :  { %714 = vmatprep.subr.bf16.mxu1 %v713_v53 }
 0x141   :  { %654 = vmatprep.mubr.msk.f32.mxu1 %vm116_vm0, %v216_v30 }
 0x142   :  { %655 = vmatmul.mubr.msk.f32.gmra.mrb[2].mxu1 %vm116_vm0, %v217_v31 }
 0x143   :  { %716 = vmatpush3.bf16.msra.mxu1 %v713_v53 }
 0x211   :  { %v653_v39 = vpop.f32.mrb[0].mxu1 }
 0x212   :  { %v313_v40 = vadd.f32 %v653_v39, %v582_v38  ;;  %v307_v41 = vpop.f32.mrb[1].mxu1 }
 0x213   :  { %v308_v42 = vadd.f32 %v582_v38, %v307_v41 }
 0x214   :  { %v327_v45 = vmax.f32 %v313_v40, 0.0 }
 0x215   :  { %v326_v43 = vmax.f32 %v308_v42, 0.0  ;;  %v656_v44 = vpop.f32.mrb[2].mxu1 }
 0x216   :  { %v323_v46 = vadd.f32 %v656_v44, %v582_v38  ;;  %v317_v47 = vpop.f32.mrb[3].mxu1 }
 0x217   :  { %v318_v48 = vadd.f32 %v582_v38, %v317_v47  ;;  %665 = vmatprep.mubr.msk.f32.mxu0 %vm116_vm0, %v326_v43 }
 0x218   :  { %666 = vmatmul.mubr.msk.f32.vlgmr.msra.gmra.mrb[4].mxu0 %vm116_vm0, %v327_v45  ;;  %v329_v50 = vmax.f32 %v323_v46, 0.0 }
 0x219   :  { %v328_v49 = vmax.f32 %v318_v48, 0.0 }
 0x21b   :  { %668 = vmatprep.mubr.msk.f32.mxu0 %vm116_vm0, %v328_v49 }
 0x21c   :  { %669 = vmatmul.mubr.msk.f32.gmra.mrb[6].mxu0 %vm116_vm0, %v329_v50 }
 0x2eb   :  { %v667_v55 = vpop.f32.mrb[4].mxu0 }
 0x2ec   :  { %v425_v56 = vadd.f32 %v667_v55, %v587_v54  ;;  %v419_v57 = vpop.f32.mrb[5].mxu0 }
 0x2ed   :  { %v420_v58 = vadd.f32 %v587_v54, %v419_v57 }
 0x2ee   :  { %v439_v61 = vmax.f32 %v425_v56, 0.0 }
 0x2ef   :  { %v438_v59 = vmax.f32 %v420_v58, 0.0  ;;  %v670_v60 = vpop.f32.mrb[6].mxu0 }
 0x2f0   :  { %v435_v62 = vadd.f32 %v670_v60, %v587_v54  ;;  %v429_v63 = vpop.f32.mrb[7].mxu0 }
 0x2f1   :  { %v430_v0 = vadd.f32 %v587_v54, %v429_v63  ;;  %679 = vmatprep.mubr.msk.f32.mxu1 %vm116_vm0, %v438_v59 }
 0x2f2   :  { %680 = vmatmul.mubr.msk.f32.vlgmr.msra.gmra.mrb[4].mxu1 %vm116_vm0, %v439_v61  ;;  %v441_v2 = vmax.f32 %v435_v62, 0.0 }
 0x2f3   :  { %v440_v1 = vmax.f32 %v430_v0, 0.0 }
 0x2f5   :  { %682 = vmatprep.mubr.msk.f32.mxu1 %vm116_vm0, %v440_v1 }
 0x2f6   :  { %683 = vmatmul.mubr.msk.f32.gmra.mrb[6].mxu1 %vm116_vm0, %v441_v2 }
 0x3c5   :  { %v681_v4 = vpop.f32.mrb[4].mxu1 }
 0x3c6   :  { %v537_v5 = vadd.f32 %v681_v4, %v592_v3  ;;  %v531_v6 = vpop.f32.mrb[5].mxu1 }
 0x3c7   :  { %v532_v7 = vadd.f32 %v592_v3, %v531_v6 }
 0x3c8   :  { %725 = vtanh.f32 %v537_v5 }
 0x3c9   :  { %727 = vtanh.f32 %v532_v7  ;;  %v684_v8 = vpop.f32.mrb[6].mxu1 }
 0x3ca   :  { %v547_v9 = vadd.f32 %v684_v8, %v592_v3  ;;  %v541_v10 = vpop.f32.mrb[7].mxu1 }
 0x3cb   :  { %v542_v11 = vadd.f32 %v592_v3, %v541_v10 }
 0x3cc   :  { %729 = vtanh.f32 %v547_v9 }
 0x3cd   :  { %731 = vtanh.f32 %v542_v11 }
 0x3d2   :  { %v726_v12 = vpop.eup %725 }
 0x3d3   :  { %v728_v13 = vpop.eup %727  ;;  %555 = vst [vmem:[#allocation11 + $0x8] sm:$0xff] %v726_v12 }
 0x3d4   :  { %554 = vst [vmem:[#allocation11] sm:$0xff] %v728_v13 }
 0x3d6   :  { %v730_v14 = vpop.eup %729 }
 0x3d7   :  { %v732_v15 = vpop.eup %731  ;;  %557 = vst [vmem:[#allocation11 + $0x18] sm:$0xff] %v730_v14 }
 0x3d8   :  { %556 = vst [vmem:[#allocation11 + $0x10] sm:$0xff] %v732_v15 }
 0x3d9   :  { %854 = shalt.err (!%p851_p2)
}
 0x3da   :  { %s855_s14 = scalar_lea.hbm %s1072_s9, 512 }
 0x3db   :  { %p856_p3 = scmp.ne.s32.totalorder %s1072_s9, %s855_s14  ;;  %p859_p4 = scmp.lt.u32.totalorder %s855_s14, %s1072_s9 }
 0x3dd   :  { %p861_p5 = pnand %p859_p4, %p856_p3 }
 0x3df   :  { %864 = shalt.err (!%p861_p5)
}
 0x3e0   :  { %569 = dma.vmem_to_hbm [thread:$0]  %s564_s13, 512, %s1072_s9, [#allocation4], %s875_s21, %s875_s21, %s876_s22  }
 0x3e1   :  { %871 = dma.done.wait [#allocation4], 512  }
 0x3e2   :  { %872 = vsyncadd [#allocation4], 4294966784 }
 0x3e3   :  { %573 = vsyncpa [#allocation3], 1 }
 0x3e4   :  { %574 = vsyncpa [#allocation6], 1 }
 0x3e5   :  { %575 = vsyncpa [#allocation9], 1 }
 0x3e6   :  { %576 = vsyncpa [#allocation4], 1 }

</bundles_post_ra>
